<compile_context>
chip_gen: v5e
topology: v5e:2x2
jax: 0.10.0
libtpu: 0.0.40
codegen_flags: <defaults>
</compile_context>

<pallas_src>
import functools

import jax
import jax.numpy as jnp
from jax import lax
from jax.experimental import pallas as pl
from jax.experimental.pallas import tpu as pltpu

_EPS = 1e-8
_LANES = 128
_TILE_ROWS_MAX = 2048
_VMEM_INPUT_BUDGET = 10 * 1024 * 1024   # double-buffered input blocks (all gens)
_FUSED_VMEM_LIMIT = 10 * 1024 * 1024    # fused single-pass path threshold


def _cdiv(a, b):
    return (a + b - 1) // b


def _round_up(a, b):
    return _cdiv(a, b) * b


def _sublane_multiple(dtype):
    # f32 -> 8, bf16 -> 16, int8/fp8 -> 32
    itemsize = jnp.dtype(dtype).itemsize
    return max(8, 32 // max(1, itemsize))


# ----------------------------------------------------------------------------
# Fused single-pass kernel (small inputs): global min/max + normalize + MSE
# ----------------------------------------------------------------------------
def _make_fused_kernel(n, total, rows):
    needs_mask = (rows * _LANES != total)

    def kernel(*refs):
        hm_refs = refs[:n]
        tgt_ref = refs[n]
        out_ref = refs[n + 1]

        if needs_mask:
            row_ids = lax.broadcasted_iota(jnp.int32, (rows, _LANES), 0)
            lane_ids = lax.broadcasted_iota(jnp.int32, (rows, _LANES), 1)
            valid = (row_ids * _LANES + lane_ids) < total
        else:
            valid = None

        def norm(ref):
            x = ref[...].astype(jnp.float32)
            if valid is None:
                mn = jnp.min(x, keepdims=True)
                mx = jnp.max(x, keepdims=True)
            else:
                mn = jnp.min(jnp.where(valid, x, jnp.inf), keepdims=True)
                mx = jnp.max(jnp.where(valid, x, -jnp.inf), keepdims=True)
            inv = jnp.float32(1.0) / (mx - mn + jnp.float32(_EPS))
            return (x - mn) * inv

        acc = norm(hm_refs[0])
        for i in range(1, n):
            acc = acc + norm(hm_refs[i])
        acc = acc - norm(tgt_ref)
        if valid is not None:
            acc = jnp.where(valid, acc, jnp.float32(0.0))  # select, not multiply
        out_ref[...] = jnp.sum(acc * acc, axis=0, keepdims=True)  # (1, 128)

    return kernel


# ----------------------------------------------------------------------------
# Gridded kernel (large inputs): scalar stats in SMEM, chunk-wise accumulation
# ----------------------------------------------------------------------------
def _make_grid_kernel(n, total, tile_rows, num_tiles, chunk_rows):
    num_chunks = tile_rows // chunk_rows
    needs_mask = (num_tiles * tile_rows * _LANES != total)

    def kernel(stats_ref, *refs):
        hm_refs = refs[:n]
        tgt_ref = refs[n]
        out_ref = refs[n + 1]

        pid = pl.program_id(0)
        invs = [stats_ref[i] for i in range(n)]
        t_inv = stats_ref[n]
        c_off = stats_ref[n + 1]

        def chunk_sq(j, masked):
            base = pl.multiple_of(j * chunk_rows, chunk_rows)
            sl = pl.ds(base, chunk_rows)
            # sum_i h_i*inv_i - t*t_inv - C   (mul+add per heatmap, no per-hm sub)
            acc = hm_refs[0][sl, :].astype(jnp.float32) * invs[0]
            for i in range(1, n):
                acc = acc + hm_refs[i][sl, :].astype(jnp.float32) * invs[i]
            acc = acc - tgt_ref[sl, :].astype(jnp.float32) * t_inv
            acc = acc - c_off
            if masked:
                row_ids = lax.broadcasted_iota(jnp.int32, (chunk_rows, _LANES), 0)
                lane_ids = lax.broadcasted_iota(jnp.int32, (chunk_rows, _LANES), 1)
                flat = (pid * tile_rows + base + row_ids) * _LANES + lane_ids
                acc = jnp.where(flat < total, acc, jnp.float32(0.0))  # select
            return acc * acc

        def accumulate(masked):
            init = jnp.zeros((chunk_rows, _LANES), jnp.float32)
            part = lax.fori_loop(
                0, num_chunks, lambda j, p: p + chunk_sq(j, masked), init)
            out_ref[0] = part

        if needs_mask:
            is_last = pid == num_tiles - 1

            @pl.when(is_last)
            def _():
                accumulate(True)

            @pl.when(pid < num_tiles - 1)
            def _():
                accumulate(False)
        else:
            accumulate(False)

    return kernel


# ----------------------------------------------------------------------------
# Wrapper
# ----------------------------------------------------------------------------
@functools.partial(jax.jit, static_argnames=("force_grid",))
def _consistency_loss_impl(heatmaps, target_heatmap, force_grid=False):
    heatmaps = list(heatmaps)
    n = len(heatmaps)
    arrays = heatmaps + [target_heatmap]
    total = int(target_heatmap.size)
    rows = _cdiv(total, _LANES)

    def to_lane_dense(a):
        flat = a.reshape(-1)
        pad = rows * _LANES - total
        if pad:
            # only the <128-element ragged tail; no round-up to the grid size
            flat = jnp.pad(flat, (0, pad))
        return flat.reshape(rows, _LANES)

    ins_2d = [to_lane_dense(a) for a in arrays]
    native_bytes = sum(int(a.size) * a.dtype.itemsize for a in arrays)

    # ---- fused single-pass path for small inputs ---------------------------
    fused_vmem = (2 * sum(rows * _LANES * a.dtype.itemsize for a in arrays)
                  + 4 * rows * _LANES * 4)
    if (not force_grid) and fused_vmem <= _FUSED_VMEM_LIMIT:
        kernel = _make_fused_kernel(n, total, rows)
        partial = pl.pallas_call(
            kernel,
            out_shape=jax.ShapeDtypeStruct((1, _LANES), jnp.float32),
            grid=(1,),
            in_specs=[pl.BlockSpec((rows, _LANES), lambda i: (0, 0))
                      for _ in ins_2d],
            out_specs=pl.BlockSpec((1, _LANES), lambda i: (0, 0)),
            compiler_params=pltpu.CompilerParams(
                dimension_semantics=("arbitrary",)),
            cost_estimate=pl.CostEstimate(
                flops=(5 * n + 10) * total, transcendentals=0,
                bytes_accessed=native_bytes + _LANES * 4),
        )(*ins_2d)
        return jnp.sum(partial) / jnp.float32(total)

    # ---- gridded path -------------------------------------------------------
    # phase 1: GLOBAL per-array min and 1/(max-min+eps); fused by jit
    mins = jnp.stack([jnp.min(a).astype(jnp.float32) for a in arrays])
    maxs = jnp.stack([jnp.max(a).astype(jnp.float32) for a in arrays])
    invs = jnp.float32(1.0) / (maxs - mins + jnp.float32(_EPS))
    # combined constant: sum_i norm(h_i) - norm(t) = sum_i h_i*inv_i - t*t_inv - C
    c_off = jnp.sum(mins[:n] * invs[:n]) - mins[n] * invs[n]
    stats = jnp.concatenate([invs, c_off[None]])        # (n+2,) f32 -> SMEM

    # chunk = per-dtype sublane multiple (bigger when there are plenty of rows)
    base_sub = max(_sublane_multiple(a.dtype) for a in arrays)
    chunk_rows = max(base_sub, 32) if rows >= 128 else base_sub

    # tile sizing under a conservative VMEM budget (double-buffered inputs)
    bytes_per_row = sum(2 * _LANES * a.dtype.itemsize for a in arrays)
    tile_rows = max(chunk_rows,
                    (_VMEM_INPUT_BUDGET // bytes_per_row) // chunk_rows * chunk_rows)
    tile_rows = min(tile_rows, _TILE_ROWS_MAX)
    num_tiles = _cdiv(rows, tile_rows)
    if num_tiles < 2 and rows > chunk_rows:
        num_tiles = 2                                    # keep both v7x TCs busy
    tile_rows = _round_up(_cdiv(rows, num_tiles), chunk_rows)
    num_tiles = _cdiv(rows, tile_rows)

    kernel = _make_grid_kernel(n, total, tile_rows, num_tiles, chunk_rows)

    partials = pl.pallas_call(
        kernel,
        out_shape=jax.ShapeDtypeStruct((num_tiles, chunk_rows, _LANES),
                                       jnp.float32),
        grid=(num_tiles,),
        in_specs=[pl.BlockSpec(memory_space=pltpu.MemorySpace.SMEM)]
        + [pl.BlockSpec((tile_rows, _LANES), lambda i: (i, 0))
           for _ in ins_2d],
        out_specs=pl.BlockSpec((1, chunk_rows, _LANES), lambda i: (i, 0, 0)),
        compiler_params=pltpu.CompilerParams(
            dimension_semantics=("parallel",)),
        cost_estimate=pl.CostEstimate(
            flops=(2 * n + 6) * total, transcendentals=0,
            bytes_accessed=native_bytes
            + num_tiles * chunk_rows * _LANES * 4 + int(stats.size) * 4),
    )(stats, *ins_2d)

    return jnp.sum(partials) / jnp.float32(total)


def consistency_loss(heatmaps, target_heatmap, force_grid=False):
    """JAX/Pallas equivalent of ConsistencyLoss.forward(heatmaps, target)."""
    return _consistency_loss_impl(tuple(heatmaps), target_heatmap,
                                  force_grid=force_grid)


# ----------------------------------------------------------------------------
# Pure-JAX reference (mirrors the PyTorch module)
# ----------------------------------------------------------------------------
def _reference_loss(heatmaps, target_heatmap):
    def norm(x):
        x = x.astype(jnp.float32)
        return (x - x.min()) / (x.max() - x.min() + _EPS)

    summed = jnp.stack([norm(h) for h in heatmaps], axis=0).sum(axis=0)
    t = norm(target_heatmap)
    return jnp.mean((summed - t) ** 2)


if __name__ == "__main__":
    N_HEATMAPS = 3

    def make_case(key, shape, scales):
        keys = jax.random.split(key, N_HEATMAPS + 1)
        hms = [jax.random.normal(keys[i], shape, dtype=jnp.float32) * scales[i]
               for i in range(N_HEATMAPS)]
        tgt = jax.random.normal(keys[-1], shape, dtype=jnp.float32)
        return hms, tgt

    # 1) small, lane-aligned shapes -> fused single-pass kernel
    hms1, tgt1 = make_case(jax.random.PRNGKey(0), (2, 4, 16, 16), (1.0, 2.0, 3.0))
    loss1 = consistency_loss(hms1, tgt1)
    jax.block_until_ready(loss1)
    ref1 = _reference_loss(hms1, tgt1)
    assert jnp.allclose(loss1, ref1, rtol=1e-4, atol=1e-6), (loss1, ref1)

    # 2) odd size with ragged <128 tail -> fused kernel with element mask
    hms2, tgt2 = make_case(jax.random.PRNGKey(1), (1, 3, 177, 131), (0.5, 1.5, 2.5))
    loss2 = consistency_loss(hms2, tgt2)
    jax.block_until_ready(loss2)
    ref2 = _reference_loss(hms2, tgt2)
    assert jnp.allclose(loss2, ref2, rtol=1e-4, atol=1e-6), (loss2, ref2)

    # 3) gridded path, 2 exact tiles, unmasked fast path
    hms3, tgt3 = make_case(jax.random.PRNGKey(2), (2, 4, 64, 64), (1.0, 2.0, 3.0))
    loss3 = consistency_loss(hms3, tgt3, force_grid=True)
    jax.block_until_ready(loss3)
    ref3 = _reference_loss(hms3, tgt3)
    assert jnp.allclose(loss3, ref3, rtol=1e-4, atol=1e-6), (loss3, ref3)

    # 4) gridded path at tiny size (2 small tiles)
    loss4 = consistency_loss(hms1, tgt1, force_grid=True)
    jax.block_until_ready(loss4)
    assert jnp.allclose(loss4, ref1, rtol=1e-4, atol=1e-6), (loss4, ref1)

    # 5) gridded path, partial trailing block + masked last tile
    loss5 = consistency_loss(hms2, tgt2, force_grid=True)
    jax.block_until_ready(loss5)
    assert jnp.allclose(loss5, ref2, rtol=1e-4, atol=1e-6), (loss5, ref2)

    print("KERNEL_OK")
</pallas_src>

<mosaic_0001>
module attributes {stable_mosaic.version = 11 : i64} {
  func.func @kernel(%arg0: i32, %arg1: memref<16x128xf32, #tpu.memory_space<vmem>>, %arg2: memref<16x128xf32, #tpu.memory_space<vmem>>, %arg3: memref<16x128xf32, #tpu.memory_space<vmem>>, %arg4: memref<16x128xf32, #tpu.memory_space<vmem>>, %arg5: memref<1x128xf32, #tpu.memory_space<vmem>>) attributes {dimension_semantics = [#tpu.dimension_semantics<arbitrary>], iteration_bounds = array<i64: 1>, scalar_prefetch = 0 : i64, scratch_operands = 0 : i64, tpu.core_type = #tpu.core_type<tc>, window_params = [{pipeline_mode = #tpu.pipeline_mode<synchronous>, transform_indices = @transform_0, window_bounds = array<i64: 16, 128>}, {pipeline_mode = #tpu.pipeline_mode<synchronous>, transform_indices = @transform_1, window_bounds = array<i64: 16, 128>}, {pipeline_mode = #tpu.pipeline_mode<synchronous>, transform_indices = @transform_2, window_bounds = array<i64: 16, 128>}, {pipeline_mode = #tpu.pipeline_mode<synchronous>, transform_indices = @transform_3, window_bounds = array<i64: 16, 128>}, {pipeline_mode = #tpu.pipeline_mode<synchronous>, transform_indices = @transform_4, window_bounds = array<i64: 1, 128>}]} {
    %c0 = arith.constant 0 : index
    %c0_0 = arith.constant 0 : index
    %0 = vector.load %arg1[%c0, %c0_0] : memref<16x128xf32, #tpu.memory_space<vmem>>, vector<16x128xf32>
    %1 = vector.shape_cast %0 : vector<16x128xf32> to vector<1x16x128xf32>
    %cst = arith.constant dense<0x7F800000> : vector<1xf32>
    %2 = vector.multi_reduction <minimumf>, %1, %cst [1, 2] : vector<1x16x128xf32> to vector<1xf32>
    %3 = vector.shape_cast %2 : vector<1xf32> to vector<1x1x1xf32>
    %4 = vector.extract %3[0, 0, 0] : f32 from vector<1x1x1xf32>
    %5 = vector.broadcast %4 : f32 to vector<1x1xf32>
    %6 = vector.shape_cast %0 : vector<16x128xf32> to vector<1x16x128xf32>
    %cst_1 = arith.constant dense<0xFF800000> : vector<1xf32>
    %7 = vector.multi_reduction <maximumf>, %6, %cst_1 [1, 2] : vector<1x16x128xf32> to vector<1xf32>
    %8 = vector.shape_cast %7 : vector<1xf32> to vector<1x1x1xf32>
    %9 = vector.extract %8[0, 0, 0] : f32 from vector<1x1x1xf32>
    %10 = vector.broadcast %9 : f32 to vector<1x1xf32>
    %11 = arith.subf %10, %5 : vector<1x1xf32>
    %cst_2 = arith.constant 9.99999993E-9 : f32
    %12 = vector.broadcast %cst_2 : f32 to vector<1x1xf32>
    %13 = arith.addf %11, %12 : vector<1x1xf32>
    %cst_3 = arith.constant 1.000000e+00 : f32
    %14 = vector.broadcast %cst_3 : f32 to vector<1x1xf32>
    %15 = arith.divf %14, %13 : vector<1x1xf32>
    %16 = vector.broadcast %5 : vector<1x1xf32> to vector<16x128xf32>
    %17 = arith.subf %0, %16 : vector<16x128xf32>
    %18 = vector.broadcast %15 : vector<1x1xf32> to vector<16x128xf32>
    %19 = arith.mulf %17, %18 : vector<16x128xf32>
    %c0_4 = arith.constant 0 : index
    %c0_5 = arith.constant 0 : index
    %20 = vector.load %arg2[%c0_4, %c0_5] : memref<16x128xf32, #tpu.memory_space<vmem>>, vector<16x128xf32>
    %21 = vector.shape_cast %20 : vector<16x128xf32> to vector<1x16x128xf32>
    %cst_6 = arith.constant dense<0x7F800000> : vector<1xf32>
    %22 = vector.multi_reduction <minimumf>, %21, %cst_6 [1, 2] : vector<1x16x128xf32> to vector<1xf32>
    %23 = vector.shape_cast %22 : vector<1xf32> to vector<1x1x1xf32>
    %24 = vector.extract %23[0, 0, 0] : f32 from vector<1x1x1xf32>
    %25 = vector.broadcast %24 : f32 to vector<1x1xf32>
    %26 = vector.shape_cast %20 : vector<16x128xf32> to vector<1x16x128xf32>
    %cst_7 = arith.constant dense<0xFF800000> : vector<1xf32>
    %27 = vector.multi_reduction <maximumf>, %26, %cst_7 [1, 2] : vector<1x16x128xf32> to vector<1xf32>
    %28 = vector.shape_cast %27 : vector<1xf32> to vector<1x1x1xf32>
    %29 = vector.extract %28[0, 0, 0] : f32 from vector<1x1x1xf32>
    %30 = vector.broadcast %29 : f32 to vector<1x1xf32>
    %31 = arith.subf %30, %25 : vector<1x1xf32>
    %cst_8 = arith.constant 9.99999993E-9 : f32
    %32 = vector.broadcast %cst_8 : f32 to vector<1x1xf32>
    %33 = arith.addf %31, %32 : vector<1x1xf32>
    %cst_9 = arith.constant 1.000000e+00 : f32
    %34 = vector.broadcast %cst_9 : f32 to vector<1x1xf32>
    %35 = arith.divf %34, %33 : vector<1x1xf32>
    %36 = vector.broadcast %25 : vector<1x1xf32> to vector<16x128xf32>
    %37 = arith.subf %20, %36 : vector<16x128xf32>
    %38 = vector.broadcast %35 : vector<1x1xf32> to vector<16x128xf32>
    %39 = arith.mulf %37, %38 : vector<16x128xf32>
    %40 = arith.addf %19, %39 : vector<16x128xf32>
    %c0_10 = arith.constant 0 : index
    %c0_11 = arith.constant 0 : index
    %41 = vector.load %arg3[%c0_10, %c0_11] : memref<16x128xf32, #tpu.memory_space<vmem>>, vector<16x128xf32>
    %42 = vector.shape_cast %41 : vector<16x128xf32> to vector<1x16x128xf32>
    %cst_12 = arith.constant dense<0x7F800000> : vector<1xf32>
    %43 = vector.multi_reduction <minimumf>, %42, %cst_12 [1, 2] : vector<1x16x128xf32> to vector<1xf32>
    %44 = vector.shape_cast %43 : vector<1xf32> to vector<1x1x1xf32>
    %45 = vector.extract %44[0, 0, 0] : f32 from vector<1x1x1xf32>
    %46 = vector.broadcast %45 : f32 to vector<1x1xf32>
    %47 = vector.shape_cast %41 : vector<16x128xf32> to vector<1x16x128xf32>
    %cst_13 = arith.constant dense<0xFF800000> : vector<1xf32>
    %48 = vector.multi_reduction <maximumf>, %47, %cst_13 [1, 2] : vector<1x16x128xf32> to vector<1xf32>
    %49 = vector.shape_cast %48 : vector<1xf32> to vector<1x1x1xf32>
    %50 = vector.extract %49[0, 0, 0] : f32 from vector<1x1x1xf32>
    %51 = vector.broadcast %50 : f32 to vector<1x1xf32>
    %52 = arith.subf %51, %46 : vector<1x1xf32>
    %cst_14 = arith.constant 9.99999993E-9 : f32
    %53 = vector.broadcast %cst_14 : f32 to vector<1x1xf32>
    %54 = arith.addf %52, %53 : vector<1x1xf32>
    %cst_15 = arith.constant 1.000000e+00 : f32
    %55 = vector.broadcast %cst_15 : f32 to vector<1x1xf32>
    %56 = arith.divf %55, %54 : vector<1x1xf32>
    %57 = vector.broadcast %46 : vector<1x1xf32> to vector<16x128xf32>
    %58 = arith.subf %41, %57 : vector<16x128xf32>
    %59 = vector.broadcast %56 : vector<1x1xf32> to vector<16x128xf32>
    %60 = arith.mulf %58, %59 : vector<16x128xf32>
    %61 = arith.addf %40, %60 : vector<16x128xf32>
    %c0_16 = arith.constant 0 : index
    %c0_17 = arith.constant 0 : index
    %62 = vector.load %arg4[%c0_16, %c0_17] : memref<16x128xf32, #tpu.memory_space<vmem>>, vector<16x128xf32>
    %63 = vector.shape_cast %62 : vector<16x128xf32> to vector<1x16x128xf32>
    %cst_18 = arith.constant dense<0x7F800000> : vector<1xf32>
    %64 = vector.multi_reduction <minimumf>, %63, %cst_18 [1, 2] : vector<1x16x128xf32> to vector<1xf32>
    %65 = vector.shape_cast %64 : vector<1xf32> to vector<1x1x1xf32>
    %66 = vector.extract %65[0, 0, 0] : f32 from vector<1x1x1xf32>
    %67 = vector.broadcast %66 : f32 to vector<1x1xf32>
    %68 = vector.shape_cast %62 : vector<16x128xf32> to vector<1x16x128xf32>
    %cst_19 = arith.constant dense<0xFF800000> : vector<1xf32>
    %69 = vector.multi_reduction <maximumf>, %68, %cst_19 [1, 2] : vector<1x16x128xf32> to vector<1xf32>
    %70 = vector.shape_cast %69 : vector<1xf32> to vector<1x1x1xf32>
    %71 = vector.extract %70[0, 0, 0] : f32 from vector<1x1x1xf32>
    %72 = vector.broadcast %71 : f32 to vector<1x1xf32>
    %73 = arith.subf %72, %67 : vector<1x1xf32>
    %cst_20 = arith.constant 9.99999993E-9 : f32
    %74 = vector.broadcast %cst_20 : f32 to vector<1x1xf32>
    %75 = arith.addf %73, %74 : vector<1x1xf32>
    %cst_21 = arith.constant 1.000000e+00 : f32
    %76 = vector.broadcast %cst_21 : f32 to vector<1x1xf32>
    %77 = arith.divf %76, %75 : vector<1x1xf32>
    %78 = vector.broadcast %67 : vector<1x1xf32> to vector<16x128xf32>
    %79 = arith.subf %62, %78 : vector<16x128xf32>
    %80 = vector.broadcast %77 : vector<1x1xf32> to vector<16x128xf32>
    %81 = arith.mulf %79, %80 : vector<16x128xf32>
    %82 = arith.subf %61, %81 : vector<16x128xf32>
    %83 = arith.mulf %82, %82 : vector<16x128xf32>
    %cst_22 = arith.constant dense<0.000000e+00> : vector<128xf32>
    %84 = vector.multi_reduction <add>, %83, %cst_22 [0] : vector<16x128xf32> to vector<128xf32>
    %85 = vector.shape_cast %84 : vector<128xf32> to vector<1x128xf32>
    %c0_23 = arith.constant 0 : index
    %c0_24 = arith.constant 0 : index
    %86 = vector.load %arg5[%c0_23, %c0_24] : memref<1x128xf32, #tpu.memory_space<vmem>>, vector<1x128xf32>
    tpu.vector_store %arg5[%c0_23, %c0_24], %85 {strides = array<i32>} : memref<1x128xf32, #tpu.memory_space<vmem>>, vector<1x128xf32>,
    return
  }
  func.func @transform_0(%arg0: i32) -> (i32, i32) {
    %c0_i32 = arith.constant 0 : i32
    %c0_i32_0 = arith.constant 0 : i32
    %c0_i32_1 = arith.constant 0 : i32
    return %c0_i32, %c0_i32_0 : i32, i32
  }
  func.func @transform_1(%arg0: i32) -> (i32, i32) {
    %c0_i32 = arith.constant 0 : i32
    %c0_i32_0 = arith.constant 0 : i32
    %c0_i32_1 = arith.constant 0 : i32
    return %c0_i32, %c0_i32_0 : i32, i32
  }
  func.func @transform_2(%arg0: i32) -> (i32, i32) {
    %c0_i32 = arith.constant 0 : i32
    %c0_i32_0 = arith.constant 0 : i32
    %c0_i32_1 = arith.constant 0 : i32
    return %c0_i32, %c0_i32_0 : i32, i32
  }
  func.func @transform_3(%arg0: i32) -> (i32, i32) {
    %c0_i32 = arith.constant 0 : i32
    %c0_i32_0 = arith.constant 0 : i32
    %c0_i32_1 = arith.constant 0 : i32
    return %c0_i32, %c0_i32_0 : i32, i32
  }
  func.func @transform_4(%arg0: i32) -> (i32, i32) {
    %c0_i32 = arith.constant 0 : i32
    %c0_i32_0 = arith.constant 0 : i32
    %c0_i32_1 = arith.constant 0 : i32
    return %c0_i32, %c0_i32_0 : i32, i32
  }
}

</mosaic_0001>

<bundles_post_ra>
// kernel: _consistency_loss_impl.1
= control target key start
LH: loop header
LB: loop body
LE: loop exit
PB: predicated region body
PF: predicated region fallthrough
CT: control target
= control target key end

     0   :  { %s360_s2 = inlined_call_operand.vmem [shape: f32[16,128], index: 2, kind: input, shape index: {}]   ;;  %s361_s1 = inlined_call_operand.vmem [shape: f32[16,128], index: 1, kind: input, shape index: {}]   ;;  %s362_s0 = inlined_call_operand.vmem [shape: f32[16,128], index: 0, kind: input, shape index: {}]   ;;  %s363_s3 = inlined_call_operand.vmem [shape: f32[16,128], index: 3, kind: input, shape index: {}]   ;;  %s364_s4 = inlined_call_operand.vmem [shape: f32[1,128], index: 4, kind: output, shape index: {}]  }
   0x1   :  { %v269_v0 = vld [vmem:[%s360_s2] sm:$0xff]  ;;  %v274_v1 = vld [vmem:[%s360_s2 + $0x8] sm:$0xff] }
   0x2   :  { %v279_v2 = vld [vmem:[%s361_s1] sm:$0xff]  ;;  %v111_v3 = vmin.f32 %v269_v0, %v274_v1  ;;  %v286_v4 = vld [vmem:[%s361_s1 + $0x8] sm:$0xff]  ;;  %v122_v9 = vmax.f32 %v269_v0, %v274_v1 }
   0x3   :  { %v291_v5 = vld [vmem:[%s362_s0] sm:$0xff]  ;;  %v296_v6 = vld [vmem:[%s362_s0 + $0x8] sm:$0xff]  ;;  %v64_v7 = vmin.f32 %v279_v2, %v286_v4  ;;  %v75_v10 = vmax.f32 %v279_v2, %v286_v4 }
   0x4   :  { %v19_v8 = vmin.f32 %v291_v5, %v296_v6  ;;  %112 = vmin.xlane.f32.xlu2 %v111_v3  ;;  %v30_v11 = vmax.f32 %v291_v5, %v296_v6  ;;  %v311_v12 = vld [vmem:[%s363_s3] sm:$0xff]  ;;  %v316_v13 = vld [vmem:[%s363_s3 + $0x8] sm:$0xff] }
   0x5   :  { %65 = vmin.xlane.f32.xlu1 %v64_v7  ;;  %v169_v14 = vmax.f32 %v311_v12, %v316_v13  ;;  %v158_v15 = vmin.f32 %v311_v12, %v316_v13 }
   0x6   :  { %20 = vmin.xlane.f32.xlu0 %v19_v8 }
   0xc   :  { %123 = vmax.xlane.f32.xlu2 %v122_v9 }
   0xd   :  { %76 = vmax.xlane.f32.xlu1 %v75_v10 }
   0xe   :  { %31 = vmax.xlane.f32.xlu0 %v30_v11 }
  0x15   :  { %170 = vmax.xlane.f32.xlu1 %v169_v14 }
  0x16   :  { %159 = vmin.xlane.f32.xlu0 %v158_v15 }
  0x77   :  { %v113_v16 = vpop.xlane.xlu2 %112 }
  0x78   :  { %v66_v17 = vpop.xlane.xlu1 %65  ;;  %v114_v21 = vrot.slane %v113_v16, 4 }
  0x79   :  { %v21_v18 = vpop.xlane.xlu0 %20  ;;  %v67_v19 = vrot.slane %v66_v17, 4 }
  0x7a   :  { %v22_v20 = vrot.slane %v21_v18, 4  ;;  %v115_v25 = vmin.f32 %v113_v16, %v114_v21 }
  0x7b   :  { %v68_v23 = vmin.f32 %v66_v17, %v67_v19 }
  0x7c   :  { %v23_v22 = vmin.f32 %v21_v18, %v22_v20  ;;  %v116_v35 = vrot.slane %v115_v25, 2 }
  0x7d   :  { %v69_v28 = vrot.slane %v68_v23, 2 }
  0x7e   :  { %v24_v24 = vrot.slane %v23_v22, 2  ;;  %v117_v45 = vmin.f32 %v115_v25, %v116_v35 }
  0x7f   :  { %v124_v26 = vpop.xlane.xlu2 %123  ;;  %v70_v41 = vmin.f32 %v68_v23, %v69_v28 }
  0x80   :  { %v25_v27 = vmin.f32 %v23_v22, %v24_v24  ;;  %v125_v29 = vrot.slane %v124_v26, 4  ;;  %v77_v30 = vpop.xlane.xlu1 %76  ;;  %v118_v56 = vrot.slane %v117_v45, 1 }
  0x81   :  { %v32_v31 = vpop.xlane.xlu0 %31  ;;  %v78_v32 = vrot.slane %v77_v30, 4  ;;  %v71_v50 = vrot.slane %v70_v41, 1 }
  0x82   :  { %v33_v33 = vrot.slane %v32_v31, 4  ;;  %v26_v34 = vrot.slane %v25_v27, 1  ;;  %v126_v36 = vmax.f32 %v124_v26, %v125_v29  ;;  %v119_v7 = vmin.f32 %v117_v45, %v118_v56 }
  0x83   :  { %v79_v37 = vmax.f32 %v77_v30, %v78_v32  ;;  %v72_v61 = vmin.f32 %v70_v41, %v71_v50 }
  0x84   :  { %v34_v38 = vmax.f32 %v32_v31, %v33_v33  ;;  %v27_v39 = vmin.f32 %v25_v27, %v26_v34  ;;  %v127_v40 = vrot.slane %v126_v36, 2 }
  0x85   :  { %v80_v42 = vrot.slane %v79_v37, 2 }
  0x86   :  { %v35_v43 = vrot.slane %v34_v38, 2  ;;  %217 = vpush %v27_v39  ;;  %v128_v44 = vmax.f32 %v126_v36, %v127_v40 }
  0x87   :  { %v81_v47 = vmax.f32 %v79_v37, %v80_v42 }
  0x88   :  { %v36_v46 = vmax.f32 %v34_v38, %v35_v43  ;;  %v171_v48 = vpop.xlane.xlu1 %170  ;;  %v129_v51 = vrot.slane %v128_v44, 1 }
  0x89   :  { %v160_v49 = vpop.xlane.xlu0 %159  ;;  %v172_v52 = vrot.slane %v171_v48, 4  ;;  %v82_v55 = vrot.slane %v81_v47, 1 }
  0x8a   :  { %v161_v53 = vrot.slane %v160_v49, 4  ;;  %v37_v54 = vrot.slane %v36_v46, 1  ;;  %v130_v3 = vmax.f32 %v128_v44, %v129_v51 }
  0x8b   :  { %v173_v57 = vmax.f32 %v171_v48, %v172_v52  ;;  %v83_v60 = vmax.f32 %v81_v47, %v82_v55 }
  0x8c   :  { %v162_v58 = vmin.f32 %v160_v49, %v161_v53  ;;  %v38_v59 = vmax.f32 %v36_v46, %v37_v54 }
  0x8d   :  { %v174_v62 = vrot.slane %v173_v57, 2 }
  0x8e   :  { %v163_v63 = vrot.slane %v162_v58, 2  ;;  %219 = vpush %v38_v59 }
  0x8f   :  { %221 = vpush %v72_v61  ;;  %v175_v8 = vmax.f32 %v173_v57, %v174_v62 }
  0x90   :  { %v164_v9 = vmin.f32 %v162_v58, %v163_v63  ;;  %223 = vpush %v83_v60 }
  0x91   :  { %225 = vpush %v119_v7  ;;  %v176_v11 = vrot.slane %v175_v8, 1 }
  0x92   :  { %227 = vpush %v130_v3  ;;  %v165_v10 = vrot.slane %v164_v9, 1 }
  0x93   :  { %v177_v15 = vmax.f32 %v175_v8, %v176_v11 }
  0x94   :  { %v166_v14 = vmin.f32 %v164_v9, %v165_v10 }
  0x96   :  { %229 = vpush %v166_v14 }
  0x97   :  { %231 = vpush %v177_v15 }
  0xb7   :  { %s218_s3 = spop %217 }
  0xb8   :  { %v322_v16 = vstv %s218_s3 }
  0xb9   :  { %v58_v41 = vsub.f32 %v291_v5, %v322_v16  ;;  %v59_v42 = vsub.f32 %v296_v6, %v322_v16 }
  0xbf   :  { %s220_s28 = spop %219 }
  0xc0   :  { %v40_v17 = vstv %s220_s28  ;;  %s222_s29 = spop %221 }
  0xc1   :  { %v41_v18 = vsub.f32 %v40_v17, %v322_v16  ;;  %v325_v19 = vstv %s222_s29  ;;  %s224_s30 = spop %223 }
  0xc2   :  { %v85_v20 = vstv %s224_s30  ;;  %s226_s5 = spop %225  ;;  %v103_v51 = vsub.f32 %v279_v2, %v325_v19  ;;  %v104_v6 = vsub.f32 %v286_v4, %v325_v19 }
  0xc3   :  { %v42_v21 = vadd.f32 1e-08, %v41_v18  ;;  %v86_v22 = vsub.f32 %v85_v20, %v325_v19  ;;  %v328_v23 = vstv %s226_s5  ;;  %s228_s6 = spop %227 }
  0xc4   :  { %v132_v24 = vstv %s228_s6  ;;  %v150_v15 = vsub.f32 %v269_v0, %v328_v23  ;;  %v151_v16 = vsub.f32 %v274_v1, %v328_v23 }
  0xc5   :  { %233 = vrcp.f32 %v42_v21  ;;  %v87_v25 = vadd.f32 1e-08, %v86_v22  ;;  %v133_v26 = vsub.f32 %v132_v24, %v328_v23  ;;  %v54_v36 = vand.u32 2147483648, %v42_v21 }
  0xc6   :  { %v52_v39 = vand.u32 2147483647, %v42_v21  ;;  %vm48_vm1 = vweird.f32 %v42_v21 }
  0xc7   :  { %s230_s7 = spop %229  ;;  %235 = vrcp.f32 %v87_v25  ;;  %v134_v27 = vadd.f32 1e-08, %v133_v26  ;;  %v99_v45 = vand.u32 2147483648, %v87_v25  ;;  %v55_v47 = vor.u32 1.1754944e-38, %v54_v36 }
  0xc8   :  { %s232_s8 = spop %231  ;;  %v331_v28 = vstv %s230_s7  ;;  %v97_v49 = vand.u32 2147483647, %v87_v25  ;;  %vm53_vm4 = vcmp.eq.f32.partialorder %v52_v39, 8.507059e+37  ;;  %vm93_vm5 = vweird.f32 %v87_v25 }
  0xc9   :  { %v179_v29 = vstv %s232_s8  ;;  %237 = vrcp.f32 %v134_v27  ;;  %v100_v55 = vor.u32 1.1754944e-38, %v99_v45  ;;  %v146_v57 = vand.u32 2147483648, %v134_v27 }
  0xca   :  { %v180_v32 = vsub.f32 %v179_v29, %v331_v28  ;;  %vm98_vm8 = vcmp.eq.f32.partialorder %v97_v49, 8.507059e+37  ;;  %v144_v59 = vand.u32 2147483647, %v134_v27  ;;  %vm140_vm9 = vweird.f32 %v134_v27 }
  0xcb   :  { %v234_v30 = vpop.eup %233  ;;  %v147_v9 = vor.u32 1.1754944e-38, %v146_v57  ;;  %v198_v22 = vsub.f32 %v316_v13, %v331_v28 }
  0xcc   :  { %v44_v31 = vmul.f32 %v234_v30, %v42_v21  ;;  %v334_v35 = vadd.f32 1e-08, %v180_v32  ;;  %vm49_vm0 = vweird.f32 %v234_v30  ;;  %vm145_vm11 = vcmp.eq.f32.partialorder %v144_v59, 8.507059e+37 }
  0xcd   :  { %v236_v33 = vpop.eup %235  ;;  %vm50_vm2 = vmor %vm48_vm1, %vm49_vm0  ;;  %v197_v21 = vsub.f32 %v311_v12, %v331_v28 }
  0xce   :  { %v45_v34 = vsub.f32 1.0, %v44_v31  ;;  %v89_v37 = vmul.f32 %v236_v33, %v87_v25  ;;  %239 = vrcp.f32 %v334_v35  ;;  %vm94_vm3 = vweird.f32 %v236_v33 }
  0xcf   :  { %v238_v40 = vpop.eup %237  ;;  %vm95_vm6 = vmor %vm93_vm5, %vm94_vm3  ;;  %v193_v10 = vand.u32 2147483648, %v334_v35  ;;  %v191_v14 = vand.u32 2147483647, %v334_v35  ;;  %vm187_vm13 = vweird.f32 %v334_v35 }
  0xd0   :  { %v46_v38 = vmul.f32 %v234_v30, %v45_v34  ;;  %v90_v43 = vsub.f32 1.0, %v89_v37  ;;  %v136_v46 = vmul.f32 %v238_v40, %v134_v27  ;;  %vm141_vm7 = vweird.f32 %v238_v40 }
  0xd1   :  { %vm142_vm10 = vmor %vm140_vm9, %vm141_vm7  ;;  %v194_v24 = vor.u32 1.1754944e-38, %v193_v10  ;;  %vm192_vm15 = vcmp.eq.f32.partialorder %v191_v14, 8.507059e+37 }
  0xd2   :  { %v47_v44 = vadd.f32 %v234_v30, %v46_v38  ;;  %v91_v48 = vmul.f32 %v236_v33, %v90_v43  ;;  %v137_v52 = vsub.f32 1.0, %v136_v46 }
  0xd4   :  { %v51_v50 = vsel %vm50_vm2, %v234_v30, %v47_v44  ;;  %v92_v53 = vadd.f32 %v236_v33, %v91_v48  ;;  %v240_v54 = vpop.eup %239  ;;  %v138_v56 = vmul.f32 %v238_v40, %v137_v52 }
  0xd5   :  { %v56_v5 = vsel %vm53_vm4, %v55_v47, %v51_v50  ;;  %v183_v60 = vmul.f32 %v240_v54, %v334_v35  ;;  %vm188_vm12 = vweird.f32 %v240_v54 }
  0xd6   :  { %v96_v58 = vsel %vm95_vm6, %v236_v33, %v92_v53  ;;  %v60_v61 = vmul.f32 %v58_v41, %v56_v5  ;;  %v139_v62 = vadd.f32 %v238_v40, %v138_v56  ;;  %v61_v63 = vmul.f32 %v59_v42, %v56_v5  ;;  %vm189_vm14 = vmor %vm187_vm13, %vm188_vm12 }
  0xd7   :  { %v101_v2 = vsel %vm98_vm8, %v100_v55, %v96_v58  ;;  %v184_v7 = vsub.f32 1.0, %v183_v60 }
  0xd8   :  { %v105_v3 = vmul.f32 %v103_v51, %v101_v2  ;;  %v106_v4 = vmul.f32 %v104_v6, %v101_v2  ;;  %v143_v8 = vsel %vm142_vm10, %v238_v40, %v139_v62 }
  0xd9   :  { %v185_v11 = vmul.f32 %v240_v54, %v184_v7  ;;  %v148_v17 = vsel %vm145_vm11, %v147_v9, %v143_v8 }
  0xda   :  { %v107_v18 = vadd.f32 %v105_v3, %v60_v61  ;;  %v108_v19 = vadd.f32 %v106_v4, %v61_v63  ;;  %v152_v25 = vmul.f32 %v150_v15, %v148_v17  ;;  %v153_v26 = vmul.f32 %v151_v16, %v148_v17 }
  0xdb   :  { %v186_v20 = vadd.f32 %v240_v54, %v185_v11 }
  0xdc   :  { %v154_v1 = vadd.f32 %v152_v25, %v107_v18  ;;  %v155_v23 = vadd.f32 %v153_v26, %v108_v19 }
  0xdd   :  { %v190_v0 = vsel %vm189_vm14, %v240_v54, %v186_v20 }
  0xde   :  { %v195_v27 = vsel %vm192_vm15, %v194_v24, %v190_v0 }
  0xdf   :  { %v199_v29 = vmul.f32 %v197_v21, %v195_v27  ;;  %v200_v30 = vmul.f32 %v198_v22, %v195_v27 }
  0xe1   :  { %v201_v31 = vsub.f32 %v154_v1, %v199_v29  ;;  %v202_v32 = vsub.f32 %v155_v23, %v200_v30 }
  0xe3   :  { %v203_v33 = vmul.f32 %v201_v31, %v201_v31  ;;  %v204_v34 = vmul.f32 %v202_v32, %v202_v32 }
  0xe5   :  { %v205_v35 = vadd.f32 %v204_v34, %v203_v33 }
  0xe7   :  { %v206_v12 = vrot.slane %v205_v35, 4 }
  0xe9   :  { %v207_v36 = vadd.f32 %v206_v12, %v205_v35 }
  0xeb   :  { %v208_v37 = vrot.slane %v207_v36, 2 }
  0xed   :  { %v209_v13 = vadd.f32 %v208_v37, %v207_v36 }
  0xef   :  { %v210_v28 = vrot.slane %v209_v13, 1 }
  0xf1   :  { %v211_v38 = vadd.f32 %v210_v28, %v209_v13 }
  0xf3   :  { %212 = vst [vmem:[%s364_s4] sm:$0x1] %v211_v38 }

</bundles_post_ra>
